<compile_context>
chip_gen: v5e
topology: v5e:2x2
jax: 0.10.0
libtpu: 0.0.40
codegen_flags: <defaults>
</compile_context>

<pallas_src>
import math

import numpy as np
import jax
import jax.numpy as jnp
from jax import lax
from jax.experimental import pallas as pl
from jax.experimental.pallas import tpu as pltpu

OUT_LANES = 128  # fused output slab width (single dense 128-lane store)


# ----------------------------------------------------------------------------
# Anchor utilities (pure numpy, identical to standard Faster R-CNN code)
# ----------------------------------------------------------------------------
def generate_anchor_base(base_size=16, ratios=(0.5, 1, 2), anchor_scales=(8, 16, 32)):
    py = base_size / 2.0
    px = base_size / 2.0
    anchor_base = np.zeros((len(ratios) * len(anchor_scales), 4), dtype=np.float32)
    for i in range(len(ratios)):
        for j in range(len(anchor_scales)):
            h = base_size * anchor_scales[j] * np.sqrt(ratios[i])
            w = base_size * anchor_scales[j] * np.sqrt(1.0 / ratios[i])
            idx = i * len(anchor_scales) + j
            anchor_base[idx, 0] = py - h / 2.0
            anchor_base[idx, 1] = px - w / 2.0
            anchor_base[idx, 2] = py + h / 2.0
            anchor_base[idx, 3] = px + w / 2.0
    return anchor_base


def enumrate_all_shift_anchor(anchor_base, feat_stride, height, width):
    shift_y = np.arange(0, height * feat_stride, feat_stride)
    shift_x = np.arange(0, width * feat_stride, feat_stride)
    shift_x, shift_y = np.meshgrid(shift_x, shift_y)
    shift = np.stack(
        (shift_y.ravel(), shift_x.ravel(), shift_y.ravel(), shift_x.ravel()), axis=1
    )
    A = anchor_base.shape[0]
    K = shift.shape[0]
    anchor = anchor_base.reshape((1, A, 4)) + shift.reshape((1, K, 4)).transpose((1, 0, 2))
    return anchor.reshape((K * A, 4)).astype(np.float32)


# ----------------------------------------------------------------------------
# ProposalCreator (CPU numpy, as in the original forward)
# ----------------------------------------------------------------------------
def loc2bbox(src_bbox, loc):
    if src_bbox.shape[0] == 0:
        return np.zeros((0, 4), dtype=loc.dtype)
    src_h = src_bbox[:, 2] - src_bbox[:, 0]
    src_w = src_bbox[:, 3] - src_bbox[:, 1]
    ctr_y = src_bbox[:, 0] + 0.5 * src_h
    ctr_x = src_bbox[:, 1] + 0.5 * src_w
    dy, dx, dh, dw = loc[:, 0], loc[:, 1], loc[:, 2], loc[:, 3]
    new_ctr_y = dy * src_h + ctr_y
    new_ctr_x = dx * src_w + ctr_x
    new_h = np.exp(dh) * src_h
    new_w = np.exp(dw) * src_w
    dst = np.zeros_like(loc)
    dst[:, 0] = new_ctr_y - 0.5 * new_h
    dst[:, 1] = new_ctr_x - 0.5 * new_w
    dst[:, 2] = new_ctr_y + 0.5 * new_h
    dst[:, 3] = new_ctr_x + 0.5 * new_w
    return dst


def nms_numpy(bbox, score, thresh):
    order = score.argsort()[::-1]
    keep = []
    while order.size > 0:
        i = order[0]
        keep.append(i)
        if order.size == 1:
            break
        yy1 = np.maximum(bbox[i, 0], bbox[order[1:], 0])
        xx1 = np.maximum(bbox[i, 1], bbox[order[1:], 1])
        yy2 = np.minimum(bbox[i, 2], bbox[order[1:], 2])
        xx2 = np.minimum(bbox[i, 3], bbox[order[1:], 3])
        inter = np.maximum(0.0, yy2 - yy1) * np.maximum(0.0, xx2 - xx1)
        area_i = (bbox[i, 2] - bbox[i, 0]) * (bbox[i, 3] - bbox[i, 1])
        area_o = (bbox[order[1:], 2] - bbox[order[1:], 0]) * (
            bbox[order[1:], 3] - bbox[order[1:], 1]
        )
        iou = inter / (area_i + area_o - inter + 1e-12)
        order = order[1:][iou <= thresh]
    return np.asarray(keep, dtype=np.int64)


def proposal_creator(loc, score, anchor, img_size, scale=1.0,
                     nms_thresh=0.7, n_pre_nms=6000, n_post_nms=300, min_size=16):
    roi = loc2bbox(anchor, loc)
    roi[:, 0] = np.clip(roi[:, 0], 0, img_size[0])
    roi[:, 2] = np.clip(roi[:, 2], 0, img_size[0])
    roi[:, 1] = np.clip(roi[:, 1], 0, img_size[1])
    roi[:, 3] = np.clip(roi[:, 3], 0, img_size[1])
    min_sz = min_size * scale
    hs = roi[:, 2] - roi[:, 0]
    ws = roi[:, 3] - roi[:, 1]
    keep = np.where((hs >= min_sz) & (ws >= min_sz))[0]
    roi, score = roi[keep], score[keep]
    order = score.ravel().argsort()[::-1][:n_pre_nms]
    roi, score = roi[order], score[order]
    keep = nms_numpy(roi, score, nms_thresh)[:n_post_nms]
    return roi[keep]


# ----------------------------------------------------------------------------
# Pallas kernel: 3x3 conv as 3 K-stacked matmuls (dy folded into K, dx via XLU roll)
# + ReLU + single fused head matmul; one lane-dense 128-wide output slab per tile.
# ----------------------------------------------------------------------------
def rpn_kernel(x_ref, w1_ref, b1_ref, wh_ref, out_ref):
    """One (batch, row-tile) grid step.

    x_ref  : (TR, 3*Cin)      bf16  rows flattened as h*(W+2)+w of the zero-padded
                                    NHWC input; the 3 dy taps are concatenated along K.
    w1_ref : (3, 3*Cin, Cp)   bf16  one K-stacked conv weight per dx tap (Cout padded).
    b1_ref : (1, Cp)          f32   conv bias + a 1.0 "ones channel" at index Cout.
    wh_ref : (Cp, 128)        bf16  fused head [loc | score | (fg-bg)]; row Cout = biases.
    out_ref: (TR, 128)        f32   fused output slab (single dense 128-lane store).
    """
    tr = out_ref.shape[0]
    x = x_ref[...]                                               # (TR, 3*Cin) bf16

    # 3x3 conv as 3 matmuls (one per dx), f32 accumulation in register values.
    acc = jnp.dot(x, w1_ref[0], preferred_element_type=jnp.float32)   # (TR, Cp)
    for dx in (1, 2):
        part = jnp.dot(x, w1_ref[dx], preferred_element_type=jnp.float32)
        # out[j] += x[j + dx] @ w  ==>  acc[j] += part[(j + dx) mod TR].
        # shift = TR - dx  (== -dx mod TR); the wrapped rows only feed the discarded
        # (w >= W) padded output columns, so the roll is exact for all valid pixels.
        acc = acc + pltpu.roll(part, shift=tr - dx, axis=0)

    h = jnp.maximum(acc + b1_ref[...], 0.0)                      # conv bias + ReLU (f32)

    # Single fused head matmul; head biases ride the constant ones channel.
    out_ref[...] = jnp.dot(h.astype(wh_ref.dtype), wh_ref[...],
                           preferred_element_type=jnp.float32)   # dense 128-lane store


def _round_up(x, m):
    return (x + m - 1) // m * m


def _pick_row_tile(H, Wp2, n_batch, max_tr=2048):
    """Pick TH (image rows per tile).  TR = TH*(W+2) must be 16-aligned (bf16 sublane
    packing).  Prefer the largest tile under max_tr rows (amortizes per-step overhead
    and fills the MXU M dimension); keep at least 2 total grid steps so v7x's second
    TensorCore has work."""
    unit = 16 // math.gcd(Wp2, 16)                      # smallest aligned TH
    th = max(unit, (max_tr // Wp2) // unit * unit)      # biggest aligned tile under cap
    th = min(th, _round_up(H, unit))                    # no point exceeding (padded) H
    while n_batch * (-(-H // th)) < 2 and th > unit:    # keep grid >= 2 steps
        th = max(unit, (th // 2) // unit * unit)
    return th


def rpn_head_pallas(x_nchw, params):
    """x_nchw: (N, Cin, H, W) float32. Returns (rpn_locs, rpn_scores, rpn_fg_scores)."""
    N, Cin, H, W = x_nchw.shape
    w1, b1 = params["w1"], params["b1"]
    wloc, bloc = params["wloc"], params["bloc"]
    wsc, bsc = params["wsc"], params["bsc"]
    Cout = w1.shape[0]
    nA = wsc.shape[0] // 2
    assert 7 * nA <= OUT_LANES, "fused output slab assumes 7*n_anchor <= 128"

    Cp = _round_up(Cout + 1, 128)          # conv-output / head-K width (+1 ones channel)
    Wp2 = W + 2
    TH = _pick_row_tile(H, Wp2, N)
    Hp = _round_up(H, TH)                  # pad image rows so TH tiles H exactly
    TR = TH * Wp2
    HPW = Hp * Wp2
    n_row_tiles = Hp // TH
    K3 = 3 * Cin

    # --- activations: NHWC, spatial zero-pad, 3 dy taps concatenated along K (3x copy,
    #     not 9x im2col); rows flattened as h*(W+2)+w so dx shifts stay inside a tile ---
    x = jnp.transpose(x_nchw, (0, 2, 3, 1))                        # NHWC
    xp = jnp.pad(x, ((0, 0), (1, 1), (1, 1), (0, 0)))              # (N, H+2, W+2, Cin)
    x3 = jnp.concatenate([xp[:, dy:dy + H, :, :] for dy in range(3)],
                         axis=-1)                                  # (N, H, W+2, 3*Cin)
    if Hp > H:
        x3 = jnp.pad(x3, ((0, 0), (0, Hp - H), (0, 0), (0, 0)))
    x3 = x3.reshape(N, HPW, K3).astype(jnp.bfloat16)

    # --- conv weights: tap dx -> (3*Cin, Cp), dy stacked along K, Cout zero-padded ---
    w1m = jnp.transpose(w1, (3, 2, 1, 0)).reshape(3, K3, Cout)     # (dx, dy*Cin + c, o)
    w1s = (jnp.zeros((3, K3, Cp), jnp.float32)
           .at[:, :, :Cout].set(w1m)
           .astype(jnp.bfloat16))
    b1row = (jnp.zeros((1, Cp), jnp.float32)
             .at[0, :Cout].set(b1)
             .at[0, Cout].set(1.0))                                # ones channel -> head biases

    # --- fused head: columns [loc | score | (fg - bg)], biases on the ones-channel row ---
    wlocm = jnp.transpose(wloc[:, :, 0, 0], (1, 0))                # (Cout, 4*nA)
    wscm = jnp.transpose(wsc[:, :, 0, 0], (1, 0))                  # (Cout, 2*nA), [bg, fg]
    wdif = wscm[:, 1::2] - wscm[:, 0::2]                           # (Cout, nA) fg - bg
    bdif = bsc[1::2] - bsc[0::2]
    whead = jnp.zeros((Cp, OUT_LANES), jnp.float32)
    whead = whead.at[:Cout, 0:4 * nA].set(wlocm)
    whead = whead.at[:Cout, 4 * nA:6 * nA].set(wscm)
    whead = whead.at[:Cout, 6 * nA:7 * nA].set(wdif)
    whead = whead.at[Cout, 0:4 * nA].set(bloc)
    whead = whead.at[Cout, 4 * nA:6 * nA].set(bsc)
    whead = whead.at[Cout, 6 * nA:7 * nA].set(bdif)
    whead = whead.astype(jnp.bfloat16)

    out = pl.pallas_call(
        rpn_kernel,
        out_shape=jax.ShapeDtypeStruct((N, HPW, OUT_LANES), jnp.float32),
        grid=(N, n_row_tiles),
        in_specs=[
            pl.BlockSpec((pl.Squeezed(), TR, K3), lambda b, t: (b, t, 0)),
            pl.BlockSpec((3, K3, Cp), lambda b, t: (0, 0, 0)),
            pl.BlockSpec((1, Cp), lambda b, t: (0, 0)),
            pl.BlockSpec((Cp, OUT_LANES), lambda b, t: (0, 0)),
        ],
        out_specs=pl.BlockSpec((pl.Squeezed(), TR, OUT_LANES), lambda b, t: (b, t, 0)),
        compiler_params=pltpu.CompilerParams(
            dimension_semantics=("parallel", "parallel"),   # both axes independent (v7x 2 TCs)
            vmem_limit_bytes=32 * 1024 * 1024,              # <= 48 MiB for v7x headroom
        ),
    )(x3, w1s, b1row, whead)

    # Drop padded rows / W columns, then slice the fused slab (channel-last per pixel,
    # identical to permute(0,2,3,1).view(...) semantics of the PyTorch module).
    out = out.reshape(N, Hp, Wp2, OUT_LANES)[:, :H, :W, :]
    rpn_locs = out[..., 0:4 * nA].reshape(N, H * W * nA, 4)
    rpn_scores = out[..., 4 * nA:6 * nA].reshape(N, H * W * nA, 2)
    # softmax([bg, fg])[1] == sigmoid(fg - bg); applied on only the nA valid lanes here
    # instead of burning the EUP on all 128 lanes inside the kernel.
    rpn_fg = jax.nn.sigmoid(out[..., 6 * nA:7 * nA]).reshape(N, H * W * nA)
    return rpn_locs, rpn_scores, rpn_fg


# ----------------------------------------------------------------------------
# Full RPN forward (kernel hot path + numpy proposal glue)
# ----------------------------------------------------------------------------
def rpn_forward(x, params, anchor_base, stride, img_size, scale=1.0):
    n, _, hh, ww = x.shape
    anchor = enumrate_all_shift_anchor(np.array(anchor_base), stride, hh, ww)
    n_anchor = anchor.shape[0] // (hh * ww)

    rpn_locs, rpn_scores, rpn_fg_scores = rpn_head_pallas(x, params)
    rpn_locs_np = np.asarray(rpn_locs)
    rpn_fg_np = np.asarray(rpn_fg_scores)

    rois, roi_indices = [], []
    for i in range(n):
        roi = proposal_creator(rpn_locs_np[i], rpn_fg_np[i], anchor, img_size, scale=scale)
        rois.append(roi)
        roi_indices.append(i * np.ones((len(roi),), dtype=np.int32))
    rois = np.concatenate(rois, axis=0)
    roi_indices = np.concatenate(roi_indices, axis=0)
    assert n_anchor == anchor_base.shape[0]
    return rpn_locs, rpn_scores, rois, roi_indices, anchor


# ----------------------------------------------------------------------------
# Deterministic parameter init (normal(0, 0.01) weights, zero bias)
# ----------------------------------------------------------------------------
def init_rpn_params(key, input_channel, output_channel, n_anchor):
    ks = jax.random.split(key, 3)
    return {
        "w1": 0.01 * jax.random.normal(ks[0], (output_channel, input_channel, 3, 3), jnp.float32),
        "b1": jnp.zeros((output_channel,), jnp.float32),
        "wsc": 0.01 * jax.random.normal(ks[1], (n_anchor * 2, output_channel, 1, 1), jnp.float32),
        "bsc": jnp.zeros((n_anchor * 2,), jnp.float32),
        "wloc": 0.01 * jax.random.normal(ks[2], (n_anchor * 4, output_channel, 1, 1), jnp.float32),
        "bloc": jnp.zeros((n_anchor * 4,), jnp.float32),
    }


if __name__ == "__main__":
    key = jax.random.PRNGKey(0)
    k_x, k_p = jax.random.split(key)

    N, Cin, H, W = 2, 4, 16, 16
    Cout = 32
    anchor_base = generate_anchor_base(16, ratios=[0.5, 1, 2], anchor_scales=[8, 16, 32])
    n_anchor = anchor_base.shape[0]          # 9
    stride = 16
    img_size = (H * stride, W * stride)      # (256, 256)

    x = jax.random.normal(k_x, (N, Cin, H, W), jnp.float32)
    params = init_rpn_params(k_p, Cin, Cout, n_anchor)

    # ---- kernel head outputs + numerics check against a plain-JAX f32 reference ----
    locs_k, scores_k, fg_k = rpn_head_pallas(x, params)
    jax.block_until_ready((locs_k, scores_k, fg_k))

    xh = jnp.transpose(x, (0, 2, 3, 1))
    h_ref = lax.conv_general_dilated(
        xh, jnp.transpose(params["w1"], (2, 3, 1, 0)), (1, 1), "SAME",
        dimension_numbers=("NHWC", "HWIO", "NHWC"),
    ) + params["b1"]
    h_ref = jnp.maximum(h_ref, 0.0)
    wlocm = jnp.transpose(params["wloc"][:, :, 0, 0], (1, 0))
    wscm = jnp.transpose(params["wsc"][:, :, 0, 0], (1, 0))
    loc_ref = (jnp.einsum("nhwc,co->nhwo", h_ref, wlocm) + params["bloc"]).reshape(N, -1, 4)
    sc_ref = jnp.einsum("nhwc,co->nhwo", h_ref, wscm) + params["bsc"]
    fg_ref = jax.nn.softmax(sc_ref.reshape(N, H, W, n_anchor, 2), axis=-1)[..., 1].reshape(N, -1)
    sc_ref = sc_ref.reshape(N, -1, 2)

    # bf16 matmul inputs (intentional, per perf review) -> compare with a moderate tolerance.
    assert np.allclose(np.asarray(loc_ref), np.asarray(locs_k), atol=3e-3, rtol=3e-2), "loc mismatch"
    assert np.allclose(np.asarray(sc_ref), np.asarray(scores_k), atol=3e-3, rtol=3e-2), "score mismatch"
    assert np.allclose(np.asarray(fg_ref), np.asarray(fg_k), atol=3e-3, rtol=3e-2), "fg mismatch"

    # ---- full forward (kernel + host-side proposal glue), as in the PyTorch module ----
    rpn_locs, rpn_scores, rois, roi_indices, anchor = rpn_forward(
        x, params, anchor_base, stride, img_size, scale=1.0
    )
    jax.block_until_ready((rpn_locs, rpn_scores))

    assert rpn_locs.shape == (N, H * W * n_anchor, 4)
    assert rpn_scores.shape == (N, H * W * n_anchor, 2)
    assert anchor.shape == (H * W * n_anchor, 4)
    assert rois.shape[0] == roi_indices.shape[0] and rois.shape[1] == 4

    print("KERNEL_OK")
</pallas_src>

<mosaic_0001>
module attributes {stable_mosaic.version = 11 : i64} {
  func.func @rpn_kernel(%arg0: i32, %arg1: i32, %arg2: memref<1x288x12xbf16, #tpu.memory_space<vmem>>, %arg3: memref<3x12x128xbf16, #tpu.memory_space<vmem>>, %arg4: memref<1x128xf32, #tpu.memory_space<vmem>>, %arg5: memref<128x128xbf16, #tpu.memory_space<vmem>>, %arg6: memref<1x288x128xf32, #tpu.memory_space<vmem>>) attributes {dimension_semantics = [#tpu.dimension_semantics<parallel>, #tpu.dimension_semantics<parallel>], iteration_bounds = array<i64: 2, 1>, scalar_prefetch = 0 : i64, scratch_operands = 0 : i64, tpu.core_type = #tpu.core_type<tc>, window_params = [{transform_indices = @transform_0, window_bounds = array<i64: 1, 288, 12>}, {pipeline_mode = #tpu.pipeline_mode<synchronous>, transform_indices = @transform_1, window_bounds = array<i64: 3, 12, 128>}, {pipeline_mode = #tpu.pipeline_mode<synchronous>, transform_indices = @transform_2, window_bounds = array<i64: 1, 128>}, {pipeline_mode = #tpu.pipeline_mode<synchronous>, transform_indices = @transform_3, window_bounds = array<i64: 128, 128>}, {transform_indices = @transform_4, window_bounds = array<i64: 1, 288, 128>}]} {
    %c0 = arith.constant 0 : index
    %c0_0 = arith.constant 0 : index
    %c0_1 = arith.constant 0 : index
    %0 = vector.load %arg2[%c0, %c0_0, %c0_1] : memref<1x288x12xbf16, #tpu.memory_space<vmem>>, vector<1x288x12xbf16>
    %1 = vector.shape_cast %0 : vector<1x288x12xbf16> to vector<288x12xbf16>
    %c0_2 = arith.constant 0 : index
    %c0_3 = arith.constant 0 : index
    %c0_4 = arith.constant 0 : index
    %2 = vector.load %arg3[%c0_2, %c0_3, %c0_4] : memref<3x12x128xbf16, #tpu.memory_space<vmem>>, vector<1x12x128xbf16>
    %3 = vector.shape_cast %2 : vector<1x12x128xbf16> to vector<12x128xbf16>
    %cst = arith.constant dense<0.000000e+00> : vector<288x128xf32>
    %4 = tpu.matmul %1, %3, %cst {dimension_numbers = #tpu.dot_dimension_numbers<[1], [0], [0], [1], [0, 0, 1, 1], [], []>} : vector<288x12xbf16>, vector<12x128xbf16>, vector<288x128xf32> -> vector<288x128xf32>
    %c1 = arith.constant 1 : index
    %c0_5 = arith.constant 0 : index
    %c0_6 = arith.constant 0 : index
    %5 = vector.load %arg3[%c1, %c0_5, %c0_6] : memref<3x12x128xbf16, #tpu.memory_space<vmem>>, vector<1x12x128xbf16>
    %6 = vector.shape_cast %5 : vector<1x12x128xbf16> to vector<12x128xbf16>
    %cst_7 = arith.constant dense<0.000000e+00> : vector<288x128xf32>
    %7 = tpu.matmul %1, %6, %cst_7 {dimension_numbers = #tpu.dot_dimension_numbers<[1], [0], [0], [1], [0, 0, 1, 1], [], []>} : vector<288x12xbf16>, vector<12x128xbf16>, vector<288x128xf32> -> vector<288x128xf32>
    %c287_i32 = arith.constant 287 : i32
    %8 = tpu.dynamic_rotate %7 by %c287_i32 dim 0 : vector<288x128xf32>, i32 -> vector<288x128xf32>
    %9 = arith.addf %4, %8 : vector<288x128xf32>
    %c2 = arith.constant 2 : index
    %c0_8 = arith.constant 0 : index
    %c0_9 = arith.constant 0 : index
    %10 = vector.load %arg3[%c2, %c0_8, %c0_9] : memref<3x12x128xbf16, #tpu.memory_space<vmem>>, vector<1x12x128xbf16>
    %11 = vector.shape_cast %10 : vector<1x12x128xbf16> to vector<12x128xbf16>
    %cst_10 = arith.constant dense<0.000000e+00> : vector<288x128xf32>
    %12 = tpu.matmul %1, %11, %cst_10 {dimension_numbers = #tpu.dot_dimension_numbers<[1], [0], [0], [1], [0, 0, 1, 1], [], []>} : vector<288x12xbf16>, vector<12x128xbf16>, vector<288x128xf32> -> vector<288x128xf32>
    %c286_i32 = arith.constant 286 : i32
    %13 = tpu.dynamic_rotate %12 by %c286_i32 dim 0 : vector<288x128xf32>, i32 -> vector<288x128xf32>
    %14 = arith.addf %9, %13 : vector<288x128xf32>
    %c0_11 = arith.constant 0 : index
    %c0_12 = arith.constant 0 : index
    %15 = vector.load %arg4[%c0_11, %c0_12] : memref<1x128xf32, #tpu.memory_space<vmem>>, vector<1x128xf32>
    %16 = vector.broadcast %15 : vector<1x128xf32> to vector<288x128xf32>
    %17 = arith.addf %14, %16 : vector<288x128xf32>
    %cst_13 = arith.constant 0.000000e+00 : f32
    %18 = vector.broadcast %cst_13 : f32 to vector<288x128xf32>
    %19 = arith.maximumf %17, %18 : vector<288x128xf32>
    %20 = arith.truncf %19 : vector<288x128xf32> to vector<288x128xbf16>
    %c0_14 = arith.constant 0 : index
    %c0_15 = arith.constant 0 : index
    %21 = vector.load %arg5[%c0_14, %c0_15] : memref<128x128xbf16, #tpu.memory_space<vmem>>, vector<128x128xbf16>
    %cst_16 = arith.constant dense<0.000000e+00> : vector<288x128xf32>
    %22 = tpu.matmul %20, %21, %cst_16 {dimension_numbers = #tpu.dot_dimension_numbers<[1], [0], [0], [1], [0, 0, 1, 1], [], []>} : vector<288x128xbf16>, vector<128x128xbf16>, vector<288x128xf32> -> vector<288x128xf32>
    %c0_17 = arith.constant 0 : index
    %c0_18 = arith.constant 0 : index
    %c0_19 = arith.constant 0 : index
    %23 = vector.load %arg6[%c0_17, %c0_18, %c0_19] : memref<1x288x128xf32, #tpu.memory_space<vmem>>, vector<1x288x128xf32>
    %24 = vector.shape_cast %23 : vector<1x288x128xf32> to vector<288x128xf32>
    %25 = vector.shape_cast %22 : vector<288x128xf32> to vector<1x288x128xf32>
    tpu.vector_store %arg6[%c0_17, %c0_18, %c0_19], %25 {strides = array<i32>} : memref<1x288x128xf32, #tpu.memory_space<vmem>>, vector<1x288x128xf32>,
    return
  }
  func.func @transform_0(%arg0: i32, %arg1: i32) -> (i32, i32, i32) {
    %c0_i32 = arith.constant 0 : i32
    %c0_i32_0 = arith.constant 0 : i32
    return %arg0, %arg1, %c0_i32 : i32, i32, i32
  }
  func.func @transform_1(%arg0: i32, %arg1: i32) -> (i32, i32, i32) {
    %c0_i32 = arith.constant 0 : i32
    %c0_i32_0 = arith.constant 0 : i32
    %c0_i32_1 = arith.constant 0 : i32
    %c0_i32_2 = arith.constant 0 : i32
    return %c0_i32, %c0_i32_0, %c0_i32_1 : i32, i32, i32
  }
  func.func @transform_2(%arg0: i32, %arg1: i32) -> (i32, i32) {
    %c0_i32 = arith.constant 0 : i32
    %c0_i32_0 = arith.constant 0 : i32
    %c0_i32_1 = arith.constant 0 : i32
    return %c0_i32, %c0_i32_0 : i32, i32
  }
  func.func @transform_3(%arg0: i32, %arg1: i32) -> (i32, i32) {
    %c0_i32 = arith.constant 0 : i32
    %c0_i32_0 = arith.constant 0 : i32
    %c0_i32_1 = arith.constant 0 : i32
    return %c0_i32, %c0_i32_0 : i32, i32
  }
  func.func @transform_4(%arg0: i32, %arg1: i32) -> (i32, i32, i32) {
    %c0_i32 = arith.constant 0 : i32
    %c0_i32_0 = arith.constant 0 : i32
    return %arg0, %arg1, %c0_i32 : i32, i32, i32
  }
}

</mosaic_0001>

<bundles_post_ra>
// kernel: tpu_custom_call.1
= control target key start
LH: loop header
LB: loop body
LE: loop exit
PB: predicated region body
PF: predicated region fallthrough
CT: control target
= control target key end

     0   :  { %9 = vsyncpa [#allocation3], 0  ;;  %s2163_s0 = inlined_call_operand.vmem [shape: bf16[2,288,12], index: 0, kind: input, shape index: {}]   ;;  %s2164_s1 = inlined_call_operand.vmem [shape: bf16[3,12,128], index: 1, kind: input, shape index: {}]   ;;  %s2165_s2 = inlined_call_operand.vmem [shape: f32[1,128], index: 2, kind: input, shape index: {}]   ;;  %s2166_s3 = inlined_call_operand.vmem [shape: bf16[128,128], index: 3, kind: input, shape index: {}]   ;;  %s2167_s4 = inlined_call_operand.hbm [shape: f32[2,288,128], index: 4, kind: output, shape index: {}]  }
   0x1   :  { %11 = vsyncpa [#allocation3 + $0x1], 0  ;;  %s1701_s15 = smov 0   ;;  %s1703_s16 = smov 0  }
   0x2   :  { %s1705_s17 = smov 0   ;;  %s1707_s18 = smov 0  }
   0x3   :  { %s1709_s19 = smov 0   ;;  %s1711_s20 = smov 0  }
   0x4 LB: > { %s1313_s21 = sadd.s32 4294967295, %s1672_s20   ;;  %s1314_s22 = sadd.s32 4294967294, %s1672_s20   ;;  %s1672_s20 = sphi %s1711_s20, %s17_s20   ;;  %s1668_s19 = sphi %s1709_s19, %s2174_s19   ;;  %s1664_s18 = sphi %s1707_s18, %s2173_s18   ;;  %s1660_s17 = sphi %s1705_s17, %s2172_s17   ;;  %s1656_s16 = sphi %s1703_s16, %s2171_s16   ;;  %s1652_s15 = sphi %s1701_s15, %s2170_s15  }
   0x5   : > { %s29_s23 = sadd.s32 1, %s1668_s19  ;;  %s129_s24 = sadd.s32 1, %s1660_s17 }
   0x6   : > { %p31_p0 = scmp.ge.s32.totalorder %s29_s23, 2  ;;  %p139_p1 = scmp.ne.s32.totalorder %s1660_s17, %s1656_s16 }
   0x7   : > { %p140_p2 = scmp.eq.s32.totalorder %s1313_s21, 1  ;;  %p145_p3 = scmp.ne.s32.totalorder %s1656_s16, %s1652_s15 }
   0x8   : > { %s2176_s23 = smov (%p31_p0, %s29_s23), 0  ;;  %p146_p5 = scmp.eq.s32.totalorder %s1314_s22, 1 }
   0x9   : > { %p1741_p4 = por %p140_p2, %p139_p1  ;;  %s124_s26 = ssub.s32 %s1668_s19, %s2176_s23 }
   0xa   : > { %p1317_p6 = scmp.ge.s32.totalorder %s1672_s20, 1  ;;  %p127_p7 = scmp.eq.s32.totalorder %s124_s26, 0 }
   0xb   : > { %p1748_p8 = por %p146_p5, %p145_p3  ;;  %p186_p9 = scmp.lt.s32.totalorder %s1672_s20, 3 }
   0xc   : > { %s1754_s28 = scalar_select %p127_p7, %s1660_s17, %s129_s24  }
   0xd   : > { %p187_p10 = pnand %p1317_p6, %p186_p9 }
   0xe   : > { %p217_p11 = scmp.lt.s32.totalorder (!%p187_p10), %s1664_s18, 1  ;;  %s1535_s9 = smul.u32 (!%p187_p10), 288, %s1664_s18 }
   0xf   : > { %190 = sbr.rel (%p187_p10) target bundleno = 603 (0x25b), region = 36  ;;  %s1614_s30 = scalar_lea.hbm (!%p187_p10), %s2167_s4, 576 }
  0x10   : > { %s1230_s12 = scalar_lea.hbm (!%p187_p10), %s2167_s4, %s1535_s9 }
  0x11   : > { %s1233_s14 = sshll.u32 (!%p187_p10), %s1230_s12, 4  ;;  %s1234_s14 = int_to_ptr.hbm [resolvable:$true] %s1233_s14 }
  0x14   : > { %v1395_v0 = vld [vmem:[%s2164_s1 + $0x8] sm:$0xf]  ;;  %v1515_v1 = vld [vmem:[%s2164_s1 + $0x8] sm:$0x30]  ;;  %vm419_vm0 = vcmask 1045504   ;;  %s218_s11 = scalar_select %p217_p11, %s1664_s18, 1  ;;  %v558_v26 = vlaneseq }
  0x15   : > { %v1396_v2 = vor.u32 %v1515_v1, %v1395_v0  ;;  %v1441_v3 = vld [vmem:[%s2164_s1 + $0x10] sm:$0xf]  ;;  %v1516_v4 = vld [vmem:[%s2164_s1 + $0x10] sm:$0x30]  ;;  %v1417_v6 = vld [vmem:[%s2164_s1] sm:$0xf] }
  0x16   : > { %v1442_v5 = vor.u32 %v1516_v4, %v1441_v3  ;;  %v1514_v7 = vld [vmem:[%s2164_s1] sm:$0x30]  ;;  %s1534_s22 = smul.u32 144, %s218_s11  ;;  %vm364_vm1 = vcmask 97280   ;;  %v1524_v20 = vld [vmem:[%s2166_s3 + $0x38] sm:$0xff]  ;;  %v1523_v21 = vld [vmem:[%s2166_s3 + $0x30] sm:$0xff] }
  0x17   : > { %v421_v8 = vsel %vm419_vm0, %v1396_v2, 0  ;;  %v1418_v9 = vor.u32 %v1514_v7, %v1417_v6  ;;  %1525 = vmatpush.bf16.msra.mxu3 %v1524_v20  ;;  %v1522_v22 = vld [vmem:[%s2166_s3 + $0x28] sm:$0xff]  ;;  %v1521_v23 = vld [vmem:[%s2166_s3 + $0x20] sm:$0xff]  ;;  %v1520_v28 = vld [vmem:[%s2166_s3 + $0x18] sm:$0xff]  ;;  %v1834_v29 = vshrl.u32 %v558_v26, 7 }
  0x18   : > { %430 = vmatpush.bf16.msra.mxu0 %v421_v8  ;;  %v713_v10 = vsel %vm419_vm0, %v1442_v5, 0  ;;  %s1779_s29 = scalar_lea.vmem %s2163_s0, %s1534_s22  ;;  %v1519_v30 = vld [vmem:[%s2166_s3 + $0x10] sm:$0xff]  ;;  %v1518_v36 = vld [vmem:[%s2166_s3 + $0x8] sm:$0xff]  ;;  %v1517_v39 = vld [vmem:[%s2166_s3] sm:$0xff]  ;;  %s1608_s22 = sshra.s32 %s1234_s14, 4  ;;  %s1609_s22 = int_to_ptr.hbm [resolvable:$true] %s1608_s22 }
  0x19   : > { %722 = vmatpush.bf16.msra.mxu2 %v713_v10  ;;  %v603_v11 = vsel %vm419_vm0, %v1418_v9, 0  ;;  %v1496_v12 = vld [vmem:[%s1779_s29] sm:$0xff]  ;;  %v1497_v13 = vld [vmem:[%s1779_s29 + $0x8] sm:$0xff]  ;;  %v1498_v14 = vld [vmem:[%s1779_s29 + $0x10] sm:$0xff]  ;;  %vm560_vm2 = vcmp.lt.s32.totalorder %v1834_v29, 7  ;;  %vm850_vm3 = vcmp.lt.s32.totalorder %v1834_v29, 6  ;;  %p1615_p1 = scmp.lt.s32.totalorder %s1609_s22, %s2167_s4 }
  0x1a   : > { %612 = vmatpush.bf16.msra.mxu1 %v603_v11  ;;  %v1499_v15 = vld [vmem:[%s1779_s29 + $0x18] sm:$0xff]  ;;  %v1500_v16 = vld [vmem:[%s1779_s29 + $0x20] sm:$0xff]  ;;  %v1501_v17 = vld [vmem:[%s1779_s29 + $0x28] sm:$0xff]  ;;  %s1610_s24 = scalar_lea.hbm %s1609_s22, 288 }
  0x1b   : > { %1397 = vmatmul.msk.bf16.vlgmr.msra.gmra.mxu0 %vm364_vm1, %v1496_v12  ;;  %v1502_v18 = vld [vmem:[%s1779_s29 + $0x30] sm:$0xff]  ;;  %v1503_v19 = vld [vmem:[%s1779_s29 + $0x38] sm:$0xff]  ;;  %1526 = vmatpush.bf16.msra.mxu3 %v1523_v21  ;;  %v1504_v24 = vld [vmem:[%s1779_s29 + $0x40] sm:$0xff]  ;;  %p1611_p12 = scmp.ne.s32.totalorder %s1609_s22, %s1610_s24  ;;  %p1616_p2 = scmp.lt.s32.totalorder %s1614_s30, %s1610_s24 }
  0x1c   : > { %1443 = vmatmul.msk.bf16.vlgmr.msra.gmra.mxu2 %vm364_vm1, %v1496_v12  ;;  %1081 = vmatpush.bf16.msrb.mxu0 %v1524_v20  ;;  %v1505_v43 = vld [vmem:[%s1779_s29 + $0x48] sm:$0xff]  ;;  %v1868_v51 = vld [vmem:[%s2165_s2] ss:$0 sm:$0xff]  ;;  %v1506_v1 = vld [vmem:[%s1779_s29 + $0x50] sm:$0xff] }
  0x1d   : > { %1419 = vmatmul.msk.bf16.vlgmr.msra.gmra.mxu1 %vm364_vm1, %v1496_v12  ;;  %v1507_v26 = vld [vmem:[%s1779_s29 + $0x58] sm:$0xff]  ;;  %p1612_p13 = pnand %p1611_p12, %p1741_p4  ;;  %p1617_p3 = por %p1616_p2, %p1615_p1 }
  0x1f   : > { %1527 = vmatpush.bf16.msra.mxu3 %v1522_v22  ;;  %p1613_p0 = pneg %p1612_p13 }
  0x20   : > { %1082 = vmatpush.bf16.msrb.mxu0 %v1523_v21 }
  0x21   : > { %p1618_p5 = pnand %p1617_p3, %p1613_p0 }
  0x23   : > { %1528 = vmatpush.bf16.msra.mxu3 %v1521_v23 }
  0x24   : > { %1083 = vmatpush.bf16.msrb.mxu0 %v1522_v22 }
  0x27   : > { %1529 = vmatpush.bf16.msra.mxu3 %v1520_v28 }
  0x28   : > { %1084 = vmatpush.bf16.msrb.mxu0 %v1521_v23 }
  0x2b   : > { %1398 = vmatmul.msk.bf16.gmra.mxu0 %vm364_vm1, %v1497_v13  ;;  %1530 = vmatpush.bf16.msra.mxu3 %v1519_v30 }
  0x2c   : > { %1444 = vmatmul.msk.bf16.gmra.mxu2 %vm364_vm1, %v1497_v13  ;;  %1085 = vmatpush.bf16.msrb.mxu0 %v1520_v28 }
  0x2d   : > { %1420 = vmatmul.msk.bf16.gmra.mxu1 %vm364_vm1, %v1497_v13 }
  0x2f   : > { %1531 = vmatpush.bf16.msra.mxu3 %v1518_v36 }
  0x30   : > { %1086 = vmatpush.bf16.msrb.mxu0 %v1519_v30 }
  0x33   : > { %1532 = vmatpush.bf16.msra.mxu3 %v1517_v39 }
  0x34   : > { %1087 = vmatpush.bf16.msrb.mxu0 %v1518_v36 }
  0x38   : > { %1088 = vmatpush.bf16.msrb.mxu0 %v1517_v39 }
  0x3b   : > { %1399 = vmatmul.msk.bf16.gmra.mxu0 %vm364_vm1, %v1498_v14 }
  0x3c   : > { %1445 = vmatmul.msk.bf16.gmra.mxu2 %vm364_vm1, %v1498_v14 }
  0x3d   : > { %1421 = vmatmul.msk.bf16.gmra.mxu1 %vm364_vm1, %v1498_v14 }
  0x4b   : > { %1400 = vmatmul.msk.bf16.gmra.mxu0 %vm364_vm1, %v1499_v15 }
  0x4c   : > { %1446 = vmatmul.msk.bf16.gmra.mxu2 %vm364_vm1, %v1499_v15 }
  0x4d   : > { %1422 = vmatmul.msk.bf16.gmra.mxu1 %vm364_vm1, %v1499_v15 }
  0x5b   : > { %1401 = vmatmul.msk.bf16.gmra.mxu0 %vm364_vm1, %v1500_v16 }
  0x5c   : > { %1447 = vmatmul.msk.bf16.gmra.mxu2 %vm364_vm1, %v1500_v16 }
  0x5d   : > { %1423 = vmatmul.msk.bf16.gmra.mxu1 %vm364_vm1, %v1500_v16 }
  0x6b   : > { %1402 = vmatmul.msk.bf16.gmra.mxu0 %vm364_vm1, %v1501_v17 }
  0x6c   : > { %1448 = vmatmul.msk.bf16.gmra.mxu2 %vm364_vm1, %v1501_v17 }
  0x6d   : > { %1424 = vmatmul.msk.bf16.gmra.mxu1 %vm364_vm1, %v1501_v17 }
  0x7b   : > { %1403 = vmatmul.msk.bf16.gmra.mxu0 %vm364_vm1, %v1502_v18 }
  0x7c   : > { %1449 = vmatmul.msk.bf16.gmra.mxu2 %vm364_vm1, %v1502_v18 }
  0x7d   : > { %1425 = vmatmul.msk.bf16.gmra.mxu1 %vm364_vm1, %v1502_v18 }
  0x8b   : > { %1404 = vmatmul.msk.bf16.gmra.mxu0 %vm364_vm1, %v1503_v19 }
  0x8c   : > { %1450 = vmatmul.msk.bf16.gmra.mxu2 %vm364_vm1, %v1503_v19 }
  0x8d   : > { %1426 = vmatmul.msk.bf16.gmra.mxu1 %vm364_vm1, %v1503_v19 }
  0x98   : > { %v1826_v25 = vpop.f32.mrf.mxu0 }
  0x99   : > { %v522_v33 = vrot.slane %v1826_v25, 1 }
  0x9a   : > { %v614_v27 = vpop.f32.mrf.mxu1 }
  0x9b   : > { %1405 = vmatmul.msk.bf16.gmra.mxu0 %vm364_vm1, %v1504_v24 }
  0x9c   : > { %1451 = vmatmul.msk.bf16.gmra.mxu2 %vm364_vm1, %v1504_v24 }
  0x9d   : > { %1427 = vmatmul.msk.bf16.gmra.mxu1 %vm364_vm1, %v1504_v24 }
  0x9f   : > { %v1839_v31 = vpop.f32.mrf.mxu2 }
  0xa0   : > { %v434_v32 = vpop.f32.mrf.mxu0  ;;  %v814_v41 = vrot.slane %v1839_v31, 2 }
  0xa1   : > { %v523_v34 = vrot.slane %v434_v32, 1 }
  0xa2   : > { %v616_v35 = vpop.f32.mrf.mxu1 }
  0xa3   : > { %v595_v37 = vsel %vm560_vm2, %v522_v33, %v523_v34 }
  0xa4   : > { %v615_v38 = vadd.f32 %v614_v27, %v595_v37 }
  0xa7   : > { %v726_v40 = vpop.f32.mrf.mxu2 }
  0xa8   : > { %v815_v42 = vrot.slane %v726_v40, 2  ;;  %v437_v44 = vpop.f32.mrf.mxu0 }
  0xa9   : > { %v524_v46 = vrot.slane %v437_v44, 1 }
  0xaa   : > { %v885_v45 = vsel %vm850_vm3, %v814_v41, %v815_v42  ;;  %v619_v47 = vpop.f32.mrf.mxu1 }
  0xab   : > { %v887_v48 = vadd.f32 %v885_v45, %v615_v38  ;;  %v594_v49 = vsel %vm560_vm2, %v523_v34, %v524_v46  ;;  %1406 = vmatmul.msk.bf16.gmra.mxu0 %vm364_vm1, %v1505_v43 }
  0xac   : > { %1452 = vmatmul.msk.bf16.gmra.mxu2 %vm364_vm1, %v1505_v43  ;;  %v617_v50 = vadd.f32 %v616_v35, %v594_v49 }
  0xad   : > { %1428 = vmatmul.msk.bf16.gmra.mxu1 %vm364_vm1, %v1505_v43  ;;  %v927_v57 = vadd.f32 %v1868_v51, %v887_v48 }
  0xaf   : > { %v729_v52 = vpop.f32.mrf.mxu2  ;;  %v963_v63 = vmax.f32 %v927_v57, 0.0 }
  0xb0   : > { %v816_v53 = vrot.slane %v729_v52, 2  ;;  %v439_v54 = vpop.f32.mrf.mxu0 }
  0xb1   : > { %v525_v60 = vrot.slane %v439_v54, 1 }
  0xb2   : > { %v884_v55 = vsel %vm850_vm3, %v815_v42, %v816_v53  ;;  %v621_v56 = vpop.f32.mrf.mxu1 }
  0xb3   : > { %v888_v58 = vadd.f32 %v884_v55, %v617_v50  ;;  %v593_v4 = vsel %vm560_vm2, %v524_v46, %v525_v60  ;;  %v1508_v55 = vld [vmem:[%s1779_s29 + $0x60] sm:$0xff] }
  0xb4   : > { %v620_v8 = vadd.f32 %v619_v47, %v593_v4 }
  0xb5   : > { %v928_v59 = vadd.f32 %v1868_v51, %v888_v58 }
  0xb7   : > { %v964_v61 = vmax.f32 %v928_v59, 0.0  ;;  %v731_v62 = vpop.f32.mrf.mxu2 }
  0xb8   : > { %v817_v0 = vrot.slane %v731_v62, 2  ;;  %v442_v2 = vpop.f32.mrf.mxu0 }
  0xb9   : > { %v1875_v3 = vpack.c.bf16 %v964_v61, %v963_v63  ;;  %v526_v5 = vrot.slane %v442_v2, 1 }
  0xba   : > { %v624_v6 = vpop.f32.mrf.mxu1  ;;  %v883_v7 = vsel %vm850_vm3, %v816_v53, %v817_v0 }
  0xbb   : > { %1407 = vmatmul.msk.bf16.gmra.mxu0 %vm364_vm1, %v1506_v1  ;;  %v592_v9 = vsel %vm560_vm2, %v525_v60, %v526_v5  ;;  %v889_v11 = vadd.f32 %v883_v7, %v620_v8 }
  0xbc   : > { %1453 = vmatmul.msk.bf16.gmra.mxu2 %vm364_vm1, %v1506_v1  ;;  %v622_v13 = vadd.f32 %v621_v56, %v592_v9 }
  0xbd   : > { %1429 = vmatmul.msk.bf16.gmra.mxu1 %vm364_vm1, %v1506_v1  ;;  %v929_v18 = vadd.f32 %v1868_v51, %v889_v11 }
  0xbf   : > { %v734_v10 = vpop.f32.mrf.mxu2  ;;  %v965_v22 = vmax.f32 %v929_v18, 0.0 }
  0xc0   : > { %v818_v12 = vrot.slane %v734_v10, 2  ;;  %v444_v14 = vpop.f32.mrf.mxu0 }
  0xc1   : > { %v527_v20 = vrot.slane %v444_v14, 1 }
  0xc2   : > { %v882_v15 = vsel %vm850_vm3, %v817_v0, %v818_v12  ;;  %v626_v16 = vpop.f32.mrf.mxu1 }
  0xc3   : > { %v890_v17 = vadd.f32 %v882_v15, %v622_v13  ;;  %v591_v30 = vsel %vm560_vm2, %v526_v5, %v527_v20 }
  0xc4   : > { %v625_v36 = vadd.f32 %v624_v6, %v591_v30 }
  0xc5   : > { %v930_v19 = vadd.f32 %v1868_v51, %v890_v17 }
  0xc7   : > { %v736_v21 = vpop.f32.mrf.mxu2  ;;  %v966_v23 = vmax.f32 %v930_v19, 0.0 }
  0xc8   : > { %v819_v24 = vrot.slane %v736_v21, 2  ;;  %v447_v27 = vpop.f32.mrf.mxu0 }
  0xc9   : > { %v1000_v28 = vpack.c.bf16 %v966_v23, %v965_v22  ;;  %v528_v32 = vrot.slane %v447_v27, 1 }
  0xca   : > { %v629_v34 = vpop.f32.mrf.mxu1  ;;  %v881_v35 = vsel %vm850_vm3, %v818_v12, %v819_v24 }
  0xcb   : > { %1094 = vmatmul.bf16.vlgmr.msra.gmra.mxu3 %v1000_v28  ;;  %1408 = vmatmul.msk.bf16.gmra.mxu0 %vm364_vm1, %v1507_v26  ;;  %v590_v37 = vsel %vm560_vm2, %v527_v20, %v528_v32  ;;  %v891_v39 = vadd.f32 %v881_v35, %v625_v36 }
  0xcc   : > { %1454 = vmatmul.msk.bf16.gmra.mxu2 %vm364_vm1, %v1507_v26  ;;  %v627_v42 = vadd.f32 %v626_v16, %v590_v37  ;;  %v1509_v16 = vld [vmem:[%s1779_s29 + $0x68] sm:$0xff] }
  0xcd   : > { %1430 = vmatmul.msk.bf16.gmra.mxu1 %vm364_vm1, %v1507_v26  ;;  %v931_v47 = vadd.f32 %v1868_v51, %v891_v39 }
  0xcf   : > { %v739_v38 = vpop.f32.mrf.mxu2  ;;  %v967_v52 = vmax.f32 %v931_v47, 0.0 }
  0xd0   : > { %v820_v40 = vrot.slane %v739_v38, 2  ;;  %v449_v43 = vpop.f32.mrf.mxu0 }
  0xd1   : > { %v529_v49 = vrot.slane %v449_v43, 1 }
  0xd2   : > { %v880_v44 = vsel %vm850_vm3, %v819_v24, %v820_v40  ;;  %v631_v45 = vpop.f32.mrf.mxu1 }
  0xd3   : > { %v892_v46 = vadd.f32 %v880_v44, %v627_v42  ;;  %v589_v58 = vsel %vm560_vm2, %v528_v32, %v529_v49 }
  0xd4   : > { %v630_v62 = vadd.f32 %v629_v34, %v589_v58 }
  0xd5   : > { %v932_v48 = vadd.f32 %v1868_v51, %v892_v46 }
  0xd7   : > { %v741_v50 = vpop.f32.mrf.mxu2  ;;  %v968_v53 = vmax.f32 %v932_v48, 0.0 }
  0xd8   : > { %v821_v54 = vrot.slane %v741_v50, 2  ;;  %v452_v56 = vpop.f32.mrf.mxu0 }
  0xd9   : > { %v1001_v57 = vpack.c.bf16 %v968_v53, %v967_v52  ;;  %v530_v59 = vrot.slane %v452_v56, 1 }
  0xda   : > { %v634_v60 = vpop.f32.mrf.mxu1  ;;  %v879_v61 = vsel %vm850_vm3, %v820_v40, %v821_v54 }
  0xdb   : > { %1099 = vmatmul.bf16.gmra.mxu3 %v1001_v57  ;;  %1409 = vmatmul.msk.bf16.gmra.mxu0 %vm364_vm1, %v1508_v55  ;;  %v588_v63 = vsel %vm560_vm2, %v529_v49, %v530_v59  ;;  %v893_v1 = vadd.f32 %v879_v61, %v630_v62 }
  0xdc   : > { %1455 = vmatmul.msk.bf16.gmra.mxu2 %vm364_vm1, %v1508_v55  ;;  %v632_v4 = vadd.f32 %v631_v45, %v588_v63  ;;  %v1510_v45 = vld [vmem:[%s1779_s29 + $0x70] sm:$0xff] }
  0xdd   : > { %1431 = vmatmul.msk.bf16.gmra.mxu1 %vm364_vm1, %v1508_v55  ;;  %v933_v9 = vadd.f32 %v1868_v51, %v893_v1 }
  0xdf   : > { %v744_v0 = vpop.f32.mrf.mxu2  ;;  %v969_v13 = vmax.f32 %v933_v9, 0.0 }
  0xe0   : > { %v822_v2 = vrot.slane %v744_v0, 2  ;;  %v454_v5 = vpop.f32.mrf.mxu0 }
  0xe1   : > { %v531_v11 = vrot.slane %v454_v5, 1 }
  0xe2   : > { %v878_v6 = vsel %vm850_vm3, %v821_v54, %v822_v2  ;;  %v636_v7 = vpop.f32.mrf.mxu1 }
  0xe3   : > { %v894_v8 = vadd.f32 %v878_v6, %v632_v4  ;;  %v587_v19 = vsel %vm560_vm2, %v530_v59, %v531_v11 }
  0xe4   : > { %v635_v23 = vadd.f32 %v634_v60, %v587_v19 }
  0xe5   : > { %v934_v10 = vadd.f32 %v1868_v51, %v894_v8 }
  0xe7   : > { %v746_v12 = vpop.f32.mrf.mxu2  ;;  %v970_v14 = vmax.f32 %v934_v10, 0.0 }
  0xe8   : > { %v823_v15 = vrot.slane %v746_v12, 2  ;;  %v457_v17 = vpop.f32.mrf.mxu0 }
  0xe9   : > { %v1002_v18 = vpack.c.bf16 %v970_v14, %v969_v13  ;;  %v532_v20 = vrot.slane %v457_v17, 1 }
  0xea   : > { %v639_v21 = vpop.f32.mrf.mxu1  ;;  %v877_v22 = vsel %vm850_vm3, %v822_v2, %v823_v15 }
  0xeb   : > { %1104 = vmatmul.bf16.gmra.mxu3 %v1002_v18  ;;  %1410 = vmatmul.msk.bf16.gmra.mxu0 %vm364_vm1, %v1509_v16  ;;  %v586_v24 = vsel %vm560_vm2, %v531_v11, %v532_v20  ;;  %v895_v27 = vadd.f32 %v877_v22, %v635_v23 }
  0xec   : > { %1456 = vmatmul.msk.bf16.gmra.mxu2 %vm364_vm1, %v1509_v16  ;;  %v637_v30 = vadd.f32 %v636_v7, %v586_v24  ;;  %v1511_v7 = vld [vmem:[%s1779_s29 + $0x78] sm:$0xff] }
  0xed   : > { %1432 = vmatmul.msk.bf16.gmra.mxu1 %vm364_vm1, %v1509_v16  ;;  %v935_v37 = vadd.f32 %v1868_v51, %v895_v27 }
  0xef   : > { %v749_v26 = vpop.f32.mrf.mxu2  ;;  %v971_v42 = vmax.f32 %v935_v37, 0.0 }
  0xf0   : > { %v824_v28 = vrot.slane %v749_v26, 2  ;;  %v459_v32 = vpop.f32.mrf.mxu0 }
  0xf1   : > { %v533_v39 = vrot.slane %v459_v32, 1 }
  0xf2   : > { %v876_v34 = vsel %vm850_vm3, %v823_v15, %v824_v28  ;;  %v641_v35 = vpop.f32.mrf.mxu1 }
  0xf3   : > { %v896_v36 = vadd.f32 %v876_v34, %v637_v30  ;;  %v585_v48 = vsel %vm560_vm2, %v532_v20, %v533_v39 }
  0xf4   : > { %v640_v53 = vadd.f32 %v639_v21, %v585_v48 }
  0xf5   : > { %v936_v38 = vadd.f32 %v1868_v51, %v896_v36 }
  0xf7   : > { %v751_v40 = vpop.f32.mrf.mxu2  ;;  %v972_v43 = vmax.f32 %v936_v38, 0.0 }
  0xf8   : > { %v825_v44 = vrot.slane %v751_v40, 2  ;;  %v462_v46 = vpop.f32.mrf.mxu0 }
  0xf9   : > { %v1003_v47 = vpack.c.bf16 %v972_v43, %v971_v42  ;;  %v534_v49 = vrot.slane %v462_v46, 1 }
  0xfa   : > { %v644_v50 = vpop.f32.mrf.mxu1  ;;  %v875_v52 = vsel %vm850_vm3, %v824_v28, %v825_v44 }
  0xfb   : > { %1109 = vmatmul.bf16.gmra.mxu3 %v1003_v47  ;;  %1411 = vmatmul.msk.bf16.gmra.mxu0 %vm364_vm1, %v1510_v45  ;;  %v584_v54 = vsel %vm560_vm2, %v533_v39, %v534_v49  ;;  %v897_v56 = vadd.f32 %v875_v52, %v640_v53 }
  0xfc   : > { %1457 = vmatmul.msk.bf16.gmra.mxu2 %vm364_vm1, %v1510_v45  ;;  %v642_v58 = vadd.f32 %v641_v35, %v584_v54  ;;  %v1512_v35 = vld [vmem:[%s1779_s29 + $0x80] sm:$0xff] }
  0xfd   : > { %1433 = vmatmul.msk.bf16.gmra.mxu1 %vm364_vm1, %v1510_v45  ;;  %v937_v63 = vadd.f32 %v1868_v51, %v897_v56 }
  0xff   : > { %v754_v55 = vpop.f32.mrf.mxu2  ;;  %v973_v4 = vmax.f32 %v937_v63, 0.0 }
 0x100   : > { %v826_v57 = vrot.slane %v754_v55, 2  ;;  %v464_v59 = vpop.f32.mrf.mxu0 }
 0x101   : > { %v535_v1 = vrot.slane %v464_v59, 1 }
 0x102   : > { %v874_v60 = vsel %vm850_vm3, %v825_v44, %v826_v57  ;;  %v646_v61 = vpop.f32.mrf.mxu1 }
 0x103   : > { %v898_v62 = vadd.f32 %v874_v60, %v642_v58  ;;  %v583_v10 = vsel %vm560_vm2, %v534_v49, %v535_v1 }
 0x104   : > { %v645_v14 = vadd.f32 %v644_v50, %v583_v10 }
 0x105   : > { %v938_v0 = vadd.f32 %v1868_v51, %v898_v62 }
 0x107   : > { %v756_v2 = vpop.f32.mrf.mxu2  ;;  %v974_v5 = vmax.f32 %v938_v0, 0.0 }
 0x108   : > { %v827_v6 = vrot.slane %v756_v2, 2  ;;  %v467_v8 = vpop.f32.mrf.mxu0 }
 0x109   : > { %v1004_v9 = vpack.c.bf16 %v974_v5, %v973_v4  ;;  %v536_v11 = vrot.slane %v467_v8, 1 }
 0x10a   : > { %v649_v12 = vpop.f32.mrf.mxu1  ;;  %v873_v13 = vsel %vm850_vm3, %v826_v57, %v827_v6 }
 0x10b   : > { %1114 = vmatmul.bf16.gmra.mxu3 %v1004_v9  ;;  %1412 = vmatmul.msk.bf16.gmra.mxu0 %vm364_vm1, %v1511_v7  ;;  %v582_v15 = vsel %vm560_vm2, %v535_v1, %v536_v11  ;;  %v899_v17 = vadd.f32 %v873_v13, %v645_v14 }
 0x10c   : > { %1458 = vmatmul.msk.bf16.gmra.mxu2 %vm364_vm1, %v1511_v7  ;;  %v647_v19 = vadd.f32 %v646_v61, %v582_v15  ;;  %v1513_v61 = vld [vmem:[%s1779_s29 + $0x88] sm:$0xff]  ;;  %s213_s29 = sand.u32 1, %s1656_s16  }
 0x10d   : > { %1434 = vmatmul.msk.bf16.gmra.mxu1 %vm364_vm1, %v1511_v7  ;;  %v939_v24 = vadd.f32 %v1868_v51, %v899_v17  ;;  %s1533_s7 = smul.u32 288, %s213_s29  ;;  %s1217_s21 = scalar_lea.sflag [#allocation3], %s213_s29 }
 0x10f   : > { %v759_v16 = vpop.f32.mrf.mxu2  ;;  %v975_v30 = vmax.f32 %v939_v24, 0.0  ;;  %s2008_s8 = scalar_lea.vmem [#allocation2], %s1533_s7 }
 0x110   : > { %v828_v18 = vrot.slane %v759_v16, 2  ;;  %v469_v20 = vpop.f32.mrf.mxu0  ;;  %s1231_s13 = sshll.u32 %s2008_s8, 4  ;;  %s1232_s13 = int_to_ptr.vmem [resolvable:$true] %s1231_s13 }
 0x111   : > { %v537_v27 = vrot.slane %v469_v20, 1 }
 0x112   : > { %v872_v21 = vsel %vm850_vm3, %v827_v6, %v828_v18  ;;  %v651_v22 = vpop.f32.mrf.mxu1 }
 0x113   : > { %v900_v23 = vadd.f32 %v872_v21, %v647_v19  ;;  %v581_v38 = vsel %vm560_vm2, %v536_v11, %v537_v27 }
 0x114   : > { %v650_v43 = vadd.f32 %v649_v12, %v581_v38 }
 0x115   : > { %v940_v26 = vadd.f32 %v1868_v51, %v900_v23 }
 0x117   : > { %v761_v28 = vpop.f32.mrf.mxu2  ;;  %v976_v32 = vmax.f32 %v940_v26, 0.0 }
 0x118   : > { %v829_v34 = vrot.slane %v761_v28, 2  ;;  %v472_v36 = vpop.f32.mrf.mxu0 }
 0x119   : > { %v1005_v37 = vpack.c.bf16 %v976_v32, %v975_v30  ;;  %v538_v39 = vrot.slane %v472_v36, 1 }
 0x11a   : > { %v654_v40 = vpop.f32.mrf.mxu1  ;;  %v871_v42 = vsel %vm850_vm3, %v828_v18, %v829_v34 }
 0x11b   : > { %1119 = vmatmul.bf16.gmra.mxu3 %v1005_v37  ;;  %1413 = vmatmul.msk.bf16.gmra.mxu0 %vm364_vm1, %v1512_v35  ;;  %v580_v44 = vsel %vm560_vm2, %v537_v27, %v538_v39  ;;  %v901_v46 = vadd.f32 %v871_v42, %v650_v43 }
 0x11c   : > { %1459 = vmatmul.msk.bf16.gmra.mxu2 %vm364_vm1, %v1512_v35  ;;  %v652_v48 = vadd.f32 %v651_v22, %v580_v44 }
 0x11d   : > { %1435 = vmatmul.msk.bf16.gmra.mxu1 %vm364_vm1, %v1512_v35  ;;  %v941_v54 = vadd.f32 %v1868_v51, %v901_v46 }
 0x11f   : > { %v764_v45 = vpop.f32.mrf.mxu2  ;;  %v977_v58 = vmax.f32 %v941_v54, 0.0 }
 0x120   : > { %v830_v47 = vrot.slane %v764_v45, 2  ;;  %v474_v49 = vpop.f32.mrf.mxu0 }
 0x121   : > { %v539_v56 = vrot.slane %v474_v49, 1 }
 0x122   : > { %v870_v50 = vsel %vm850_vm3, %v829_v34, %v830_v47  ;;  %v656_v52 = vpop.f32.mrf.mxu1 }
 0x123   : > { %v902_v53 = vadd.f32 %v870_v50, %v652_v48  ;;  %v579_v0 = vsel %vm560_vm2, %v538_v39, %v539_v56 }
 0x124   : > { %v655_v5 = vadd.f32 %v654_v40, %v579_v0 }
 0x125   : > { %v942_v55 = vadd.f32 %v1868_v51, %v902_v53 }
 0x127   : > { %v766_v57 = vpop.f32.mrf.mxu2  ;;  %v978_v59 = vmax.f32 %v942_v55, 0.0 }
 0x128   : > { %v831_v60 = vrot.slane %v766_v57, 2  ;;  %v477_v62 = vpop.f32.mrf.mxu0 }
 0x129   : > { %v1006_v63 = vpack.c.bf16 %v978_v59, %v977_v58  ;;  %v540_v1 = vrot.slane %v477_v62, 1 }
 0x12a   : > { %v659_v2 = vpop.f32.mrf.mxu1  ;;  %v869_v4 = vsel %vm850_vm3, %v830_v47, %v831_v60 }
 0x12b   : > { %1124 = vmatmul.bf16.gmra.mxu3 %v1006_v63  ;;  %1414 = vmatmul.msk.bf16.gmra.mxu0 %vm364_vm1, %v1513_v61  ;;  %v578_v6 = vsel %vm560_vm2, %v539_v56, %v540_v1  ;;  %v903_v8 = vadd.f32 %v869_v4, %v655_v5 }
 0x12c   : > { %1460 = vmatmul.msk.bf16.gmra.mxu2 %vm364_vm1, %v1513_v61  ;;  %v657_v10 = vadd.f32 %v656_v52, %v578_v6 }
 0x12d   : > { %1436 = vmatmul.msk.bf16.gmra.mxu1 %vm364_vm1, %v1513_v61  ;;  %v943_v15 = vadd.f32 %v1868_v51, %v903_v8 }
 0x12f   : > { %v769_v7 = vpop.f32.mrf.mxu2  ;;  %v979_v19 = vmax.f32 %v943_v15, 0.0 }
 0x130   : > { %v832_v9 = vrot.slane %v769_v7, 2  ;;  %v479_v11 = vpop.f32.mrf.mxu0 }
 0x131   : > { %v541_v17 = vrot.slane %v479_v11, 1 }
 0x132   : > { %v868_v12 = vsel %vm850_vm3, %v831_v60, %v832_v9  ;;  %v661_v13 = vpop.f32.mrf.mxu1 }
 0x133   : > { %v904_v14 = vadd.f32 %v868_v12, %v657_v10  ;;  %v577_v24 = vsel %vm560_vm2, %v540_v1, %v541_v17 }
 0x134   : > { %v660_v30 = vadd.f32 %v659_v2, %v577_v24 }
 0x135   : > { %v944_v16 = vadd.f32 %v1868_v51, %v904_v14 }
 0x137   : > { %v771_v18 = vpop.f32.mrf.mxu2  ;;  %v980_v20 = vmax.f32 %v944_v16, 0.0 }
 0x138   : > { %v833_v21 = vrot.slane %v771_v18, 2  ;;  %v482_v22 = vpop.f32.mrf.mxu0 }
 0x139   : > { %v1007_v23 = vpack.c.bf16 %v980_v20, %v979_v19  ;;  %v542_v26 = vrot.slane %v482_v22, 1 }
 0x13a   : > { %v664_v27 = vpop.f32.mrf.mxu1  ;;  %v867_v28 = vsel %vm850_vm3, %v832_v9, %v833_v21 }
 0x13b   : > { %1129 = vmatmul.bf16.gmra.mxu3 %v1007_v23  ;;  %1089 = vmatmul.bf16.vlgmr.msrb.gmra.mxu0 %v1875_v3  ;;  %v576_v32 = vsel %vm560_vm2, %v541_v17, %v542_v26  ;;  %v905_v35 = vadd.f32 %v867_v28, %v660_v30 }
 0x13c   : > { %v662_v37 = vadd.f32 %v661_v13, %v576_v32 }
 0x13d   : > { %v945_v43 = vadd.f32 %v1868_v51, %v905_v35 }
 0x13f   : > { %v774_v34 = vpop.f32.mrf.mxu2  ;;  %v981_v46 = vmax.f32 %v945_v43, 0.0 }
 0x140   : > { %v834_v36 = vrot.slane %v774_v34, 2  ;;  %v484_v38 = vpop.f32.mrf.mxu0 }
 0x141   : > { %v543_v3 = vrot.slane %v484_v38, 1 }
 0x142   : > { %v866_v39 = vsel %vm850_vm3, %v833_v21, %v834_v36  ;;  %v666_v40 = vpop.f32.mrf.mxu1 }
 0x143   : > { %v906_v42 = vadd.f32 %v866_v39, %v662_v37  ;;  %v575_v52 = vsel %vm560_vm2, %v542_v26, %v543_v3 }
 0x144   : > { %v665_v56 = vadd.f32 %v664_v27, %v575_v52 }
 0x145   : > { %v946_v44 = vadd.f32 %v1868_v51, %v906_v42 }
 0x147   : > { %v776_v45 = vpop.f32.mrf.mxu2  ;;  %v982_v47 = vmax.f32 %v946_v44, 0.0 }
 0x148   : > { %v835_v48 = vrot.slane %v776_v45, 2  ;;  %v487_v49 = vpop.f32.mrf.mxu0 }
 0x149   : > { %v1008_v50 = vpack.c.bf16 %v982_v47, %v981_v46  ;;  %v544_v53 = vrot.slane %v487_v49, 1 }
 0x14a   : > { %v669_v54 = vpop.f32.mrf.mxu1  ;;  %v865_v55 = vsel %vm850_vm3, %v834_v36, %v835_v48 }
 0x14b   : > { %1134 = vmatmul.bf16.gmra.mxu3 %v1008_v50  ;;  %v574_v57 = vsel %vm560_vm2, %v543_v3, %v544_v53  ;;  %v907_v60 = vadd.f32 %v865_v55, %v665_v56 }
 0x14c   : > { %v667_v62 = vadd.f32 %v666_v40, %v574_v57 }
 0x14d   : > { %v947_v4 = vadd.f32 %v1868_v51, %v907_v60 }
 0x14e   : > { %v1095_v58 = vpop.f32.mrf.mxu3 }
 0x14f   : > { %1182 = vst [vmem:[%s2008_s8 + $0x10] sm:$0xff] %v1095_v58  ;;  %v779_v59 = vpop.f32.mrf.mxu2  ;;  %v983_v9 = vmax.f32 %v947_v4, 0.0 }
 0x150   : > { %v836_v61 = vrot.slane %v779_v59, 2  ;;  %v489_v63 = vpop.f32.mrf.mxu0 }
 0x151   : > { %v545_v6 = vrot.slane %v489_v63, 1 }
 0x152   : > { %v864_v0 = vsel %vm850_vm3, %v835_v48, %v836_v61  ;;  %v671_v1 = vpop.f32.mrf.mxu1 }
 0x153   : > { %v908_v2 = vadd.f32 %v864_v0, %v667_v62  ;;  %v573_v14 = vsel %vm560_vm2, %v544_v53, %v545_v6 }
 0x154   : > { %v670_v18 = vadd.f32 %v669_v54, %v573_v14 }
 0x155   : > { %v948_v5 = vadd.f32 %v1868_v51, %v908_v2 }
 0x156   : > { %v1097_v7 = vpop.f32.mrf.mxu3 }
 0x157   : > { %1183 = vst [vmem:[%s2008_s8 + $0x18] sm:$0xff] %v1097_v7  ;;  %v781_v8 = vpop.f32.mrf.mxu2  ;;  %v984_v10 = vmax.f32 %v948_v5, 0.0 }
 0x158   : > { %v837_v11 = vrot.slane %v781_v8, 2  ;;  %v492_v12 = vpop.f32.mrf.mxu0 }
 0x159   : > { %v1009_v13 = vpack.c.bf16 %v984_v10, %v983_v9  ;;  %v546_v15 = vrot.slane %v492_v12, 1 }
 0x15a   : > { %v674_v16 = vpop.f32.mrf.mxu1  ;;  %v863_v17 = vsel %vm850_vm3, %v836_v61, %v837_v11 }
 0x15b   : > { %1139 = vmatmul.bf16.gmra.mxu3 %v1009_v13  ;;  %v572_v19 = vsel %vm560_vm2, %v545_v6, %v546_v15  ;;  %v909_v22 = vadd.f32 %v863_v17, %v670_v18 }
 0x15c   : > { %v672_v24 = vadd.f32 %v671_v1, %v572_v19 }
 0x15d   : > { %v949_v32 = vadd.f32 %v1868_v51, %v909_v22 }
 0x15e   : > { %v1100_v20 = vpop.f32.mrf.mxu3 }
 0x15f   : > { %1184 = vst [vmem:[%s2008_s8 + $0x20] sm:$0xff] %v1100_v20  ;;  %v784_v21 = vpop.f32.mrf.mxu2  ;;  %v985_v38 = vmax.f32 %v949_v32, 0.0 }
 0x160   : > { %v838_v23 = vrot.slane %v784_v21, 2  ;;  %v494_v26 = vpop.f32.mrf.mxu0 }
 0x161   : > { %v547_v35 = vrot.slane %v494_v26, 1 }
 0x162   : > { %v862_v27 = vsel %vm850_vm3, %v837_v11, %v838_v23  ;;  %v676_v28 = vpop.f32.mrf.mxu1 }
 0x163   : > { %v910_v30 = vadd.f32 %v862_v27, %v672_v24  ;;  %v571_v44 = vsel %vm560_vm2, %v546_v15, %v547_v35 }
 0x164   : > { %v675_v47 = vadd.f32 %v674_v16, %v571_v44 }
 0x165   : > { %v950_v34 = vadd.f32 %v1868_v51, %v910_v30 }
 0x166   : > { %v1102_v36 = vpop.f32.mrf.mxu3 }
 0x167   : > { %1185 = vst [vmem:[%s2008_s8 + $0x28] sm:$0xff] %v1102_v36  ;;  %v786_v37 = vpop.f32.mrf.mxu2  ;;  %v986_v39 = vmax.f32 %v950_v34, 0.0 }
 0x168   : > { %v839_v40 = vrot.slane %v786_v37, 2  ;;  %v497_v42 = vpop.f32.mrf.mxu0 }
 0x169   : > { %v1010_v43 = vpack.c.bf16 %v986_v39, %v985_v38  ;;  %v548_v3 = vrot.slane %v497_v42, 1 }
 0x16a   : > { %v679_v45 = vpop.f32.mrf.mxu1  ;;  %v861_v46 = vsel %vm850_vm3, %v838_v23, %v839_v40 }
 0x16b   : > { %1144 = vmatmul.bf16.gmra.mxu3 %v1010_v43  ;;  %v570_v48 = vsel %vm560_vm2, %v547_v35, %v548_v3  ;;  %v911_v52 = vadd.f32 %v861_v46, %v675_v47 }
 0x16c   : > { %v677_v54 = vadd.f32 %v676_v28, %v570_v48 }
 0x16d   : > { %v951_v59 = vadd.f32 %v1868_v51, %v911_v52 }
 0x16e   : > { %v1105_v49 = vpop.f32.mrf.mxu3 }
 0x16f   : > { %1186 = vst [vmem:[%s2008_s8 + $0x30] sm:$0xff] %v1105_v49  ;;  %v789_v50 = vpop.f32.mrf.mxu2  ;;  %v987_v0 = vmax.f32 %v951_v59, 0.0 }
 0x170   : > { %v840_v53 = vrot.slane %v789_v50, 2  ;;  %v499_v55 = vpop.f32.mrf.mxu0 }
 0x171   : > { %v549_v61 = vrot.slane %v499_v55, 1 }
 0x172   : > { %v860_v56 = vsel %vm850_vm3, %v839_v40, %v840_v53  ;;  %v681_v57 = vpop.f32.mrf.mxu1 }
 0x173   : > { %v912_v58 = vadd.f32 %v860_v56, %v677_v54  ;;  %v569_v6 = vsel %vm560_vm2, %v548_v3, %v549_v61 }
 0x174   : > { %v680_v10 = vadd.f32 %v679_v45, %v569_v6 }
 0x175   : > { %v952_v60 = vadd.f32 %v1868_v51, %v912_v58 }
 0x176   : > { %v1107_v62 = vpop.f32.mrf.mxu3 }
 0x177   : > { %1187 = vst [vmem:[%s2008_s8 + $0x38] sm:$0xff] %v1107_v62  ;;  %v791_v63 = vpop.f32.mrf.mxu2  ;;  %v988_v1 = vmax.f32 %v952_v60, 0.0 }
 0x178   : > { %v841_v2 = vrot.slane %v791_v63, 2  ;;  %v502_v4 = vpop.f32.mrf.mxu0 }
 0x179   : > { %v1011_v5 = vpack.c.bf16 %v988_v1, %v987_v0  ;;  %v550_v7 = vrot.slane %v502_v4, 1 }
 0x17a   : > { %v684_v8 = vpop.f32.mrf.mxu1  ;;  %v859_v9 = vsel %vm850_vm3, %v840_v53, %v841_v2 }
 0x17b   : > { %1149 = vmatmul.bf16.gmra.mxu3 %v1011_v5  ;;  %v568_v11 = vsel %vm560_vm2, %v549_v61, %v550_v7  ;;  %v913_v13 = vadd.f32 %v859_v9, %v680_v10 }
 0x17c   : > { %v682_v16 = vadd.f32 %v681_v57, %v568_v11 }
 0x17d   : > { %v953_v21 = vadd.f32 %v1868_v51, %v913_v13 }
 0x17e   : > { %v1110_v12 = vpop.f32.mrf.mxu3 }
 0x17f   : > { %1188 = vst [vmem:[%s2008_s8 + $0x40] sm:$0xff] %v1110_v12  ;;  %v794_v14 = vpop.f32.mrf.mxu2  ;;  %v989_v27 = vmax.f32 %v953_v21, 0.0 }
 0x180   : > { %v842_v15 = vrot.slane %v794_v14, 2  ;;  %v504_v17 = vpop.f32.mrf.mxu0 }
 0x181   : > { %v551_v23 = vrot.slane %v504_v17, 1 }
 0x182   : > { %v858_v18 = vsel %vm850_vm3, %v841_v2, %v842_v15  ;;  %v686_v19 = vpop.f32.mrf.mxu1 }
 0x183   : > { %v914_v20 = vadd.f32 %v858_v18, %v682_v16  ;;  %v567_v35 = vsel %vm560_vm2, %v550_v7, %v551_v23 }
 0x184   : > { %v685_v39 = vadd.f32 %v684_v8, %v567_v35 }
 0x185   : > { %v954_v22 = vadd.f32 %v1868_v51, %v914_v20 }
 0x186   : > { %v1112_v24 = vpop.f32.mrf.mxu3 }
 0x187   : > { %1189 = vst [vmem:[%s2008_s8 + $0x48] sm:$0xff] %v1112_v24  ;;  %v796_v26 = vpop.f32.mrf.mxu2  ;;  %v990_v28 = vmax.f32 %v954_v22, 0.0 }
 0x188   : > { %v843_v30 = vrot.slane %v796_v26, 2  ;;  %v507_v32 = vpop.f32.mrf.mxu0 }
 0x189   : > { %v1012_v34 = vpack.c.bf16 %v990_v28, %v989_v27  ;;  %v552_v36 = vrot.slane %v507_v32, 1 }
 0x18a   : > { %v689_v37 = vpop.f32.mrf.mxu1  ;;  %v857_v38 = vsel %vm850_vm3, %v842_v15, %v843_v30 }
 0x18b   : > { %1154 = vmatmul.bf16.gmra.mxu3 %v1012_v34  ;;  %v566_v40 = vsel %vm560_vm2, %v551_v23, %v552_v36  ;;  %v915_v43 = vadd.f32 %v857_v38, %v685_v39 }
 0x18c   : > { %v687_v45 = vadd.f32 %v686_v19, %v566_v40 }
 0x18d   : > { %v955_v50 = vadd.f32 %v1868_v51, %v915_v43 }
 0x18e   : > { %v1115_v42 = vpop.f32.mrf.mxu3 }
 0x18f   : > { %1190 = vst [vmem:[%s2008_s8 + $0x50] sm:$0xff] %v1115_v42  ;;  %v799_v44 = vpop.f32.mrf.mxu2  ;;  %v991_v56 = vmax.f32 %v955_v50, 0.0 }
 0x190   : > { %v844_v3 = vrot.slane %v799_v44, 2  ;;  %v509_v46 = vpop.f32.mrf.mxu0 }
 0x191   : > { %v553_v53 = vrot.slane %v509_v46, 1 }
 0x192   : > { %v856_v47 = vsel %vm850_vm3, %v843_v30, %v844_v3  ;;  %v691_v48 = vpop.f32.mrf.mxu1 }
 0x193   : > { %v916_v49 = vadd.f32 %v856_v47, %v687_v45  ;;  %v565_v61 = vsel %vm560_vm2, %v552_v36, %v553_v53 }
 0x194   : > { %v690_v1 = vadd.f32 %v689_v37, %v565_v61 }
 0x195   : > { %v956_v52 = vadd.f32 %v1868_v51, %v916_v49 }
 0x196   : > { %v1117_v54 = vpop.f32.mrf.mxu3 }
 0x197   : > { %1191 = vst [vmem:[%s2008_s8 + $0x58] sm:$0xff] %v1117_v54  ;;  %v801_v55 = vpop.f32.mrf.mxu2  ;;  %v992_v57 = vmax.f32 %v956_v52, 0.0 }
 0x198   : > { %v845_v58 = vrot.slane %v801_v55, 2  ;;  %v512_v59 = vpop.f32.mrf.mxu0 }
 0x199   : > { %v1013_v60 = vpack.c.bf16 %v992_v57, %v991_v56  ;;  %v554_v62 = vrot.slane %v512_v59, 1 }
 0x19a   : > { %v694_v63 = vpop.f32.mrf.mxu1  ;;  %v855_v0 = vsel %vm850_vm3, %v844_v3, %v845_v58 }
 0x19b   : > { %1159 = vmatmul.bf16.gmra.mxu3 %v1013_v60  ;;  %v564_v2 = vsel %vm560_vm2, %v553_v53, %v554_v62  ;;  %v917_v5 = vadd.f32 %v855_v0, %v690_v1 }
 0x19c   : > { %v692_v8 = vadd.f32 %v691_v48, %v564_v2 }
 0x19d   : > { %v957_v12 = vadd.f32 %v1868_v51, %v917_v5 }
 0x19e   : > { %v1120_v4 = vpop.f32.mrf.mxu3 }
 0x19f   : > { %1192 = vst [vmem:[%s2008_s8 + $0x60] sm:$0xff] %v1120_v4  ;;  %v804_v6 = vpop.f32.mrf.mxu2  ;;  %v993_v18 = vmax.f32 %v957_v12, 0.0 }
 0x1a0   : > { %v846_v7 = vrot.slane %v804_v6, 2  ;;  %v514_v9 = vpop.f32.mrf.mxu0 }
 0x1a1   : > { %v555_v15 = vrot.slane %v514_v9, 1 }
 0x1a2   : > { %v854_v10 = vsel %vm850_vm3, %v845_v58, %v846_v7  ;;  %v696_v13 = vpop.f32.mrf.mxu1 }
 0x1a3   : > { %v918_v11 = vadd.f32 %v854_v10, %v692_v8  ;;  %v563_v23 = vsel %vm560_vm2, %v554_v62, %v555_v15 }
 0x1a4   : > { %v695_v27 = vadd.f32 %v694_v63, %v563_v23 }
 0x1a5   : > { %v958_v14 = vadd.f32 %v1868_v51, %v918_v11 }
 0x1a6   : > { %v1122_v16 = vpop.f32.mrf.mxu3 }
 0x1a7   : > { %1193 = vst [vmem:[%s2008_s8 + $0x68] sm:$0xff] %v1122_v16  ;;  %v806_v17 = vpop.f32.mrf.mxu2  ;;  %v994_v19 = vmax.f32 %v958_v14, 0.0 }
 0x1a8   : > { %v847_v20 = vrot.slane %v806_v17, 2  ;;  %v517_v21 = vpop.f32.mrf.mxu0 }
 0x1a9   : > { %v1014_v22 = vpack.c.bf16 %v994_v19, %v993_v18  ;;  %v556_v24 = vrot.slane %v517_v21, 1 }
 0x1aa   : > { %v853_v26 = vsel %vm850_vm3, %v846_v7, %v847_v20  ;;  %v699_v30 = vpop.f32.mrf.mxu1 }
 0x1ab   : > { %1164 = vmatmul.bf16.gmra.mxu3 %v1014_v22  ;;  %v562_v28 = vsel %vm560_vm2, %v555_v15, %v556_v24  ;;  %v919_v34 = vadd.f32 %v853_v26, %v695_v27 }
 0x1ac   : > { %v697_v37 = vadd.f32 %v696_v13, %v562_v28 }
 0x1ad   : > { %v959_v42 = vadd.f32 %v1868_v51, %v919_v34 }
 0x1ae   : > { %v1125_v32 = vpop.f32.mrf.mxu3 }
 0x1af   : > { %1194 = vst [vmem:[%s2008_s8 + $0x70] sm:$0xff] %v1125_v32  ;;  %v809_v35 = vpop.f32.mrf.mxu2  ;;  %v995_v46 = vmax.f32 %v959_v42, 0.0 }
 0x1b0   : > { %v848_v36 = vrot.slane %v809_v35, 2  ;;  %v519_v38 = vpop.f32.mrf.mxu0 }
 0x1b1   : > { %v557_v43 = vrot.slane %v519_v38, 1 }
 0x1b2   : > { %v852_v39 = vsel %vm850_vm3, %v847_v20, %v848_v36  ;;  %v701_v50 = vpop.f32.mrf.mxu1 }
 0x1b3   : > { %v920_v40 = vadd.f32 %v852_v39, %v697_v37  ;;  %v561_v48 = vsel %vm560_vm2, %v556_v24, %v557_v43  ;;  %v596_v49 = vsel %vm560_vm2, %v557_v43, %v522_v33 }
 0x1b4   : > { %v700_v57 = vadd.f32 %v699_v30, %v561_v48  ;;  %v702_v25 = vadd.f32 %v701_v50, %v596_v49 }
 0x1b5   : > { %v960_v44 = vadd.f32 %v1868_v51, %v920_v40 }
 0x1b6   : > { %v1127_v3 = vpop.f32.mrf.mxu3 }
 0x1b7   : > { %1195 = vst [vmem:[%s2008_s8 + $0x78] sm:$0xff] %v1127_v3  ;;  %v811_v45 = vpop.f32.mrf.mxu2  ;;  %v996_v47 = vmax.f32 %v960_v44, 0.0 }
 0x1b8   : > { %v849_v52 = vrot.slane %v811_v45, 2  ;;  %v1090_v53 = vpop.f32.mrf.mxu0 }
 0x1b9   : > { %v1015_v54 = vpack.c.bf16 %v996_v47, %v995_v46  ;;  %1180 = vst [vmem:[%s2008_s8] sm:$0xff] %v1090_v53 }
 0x1ba   : > { %v851_v55 = vsel %vm850_vm3, %v848_v36, %v849_v52  ;;  %v886_v56 = vsel %vm850_vm3, %v849_v52, %v814_v41 }
 0x1bb   : > { %1169 = vmatmul.bf16.gmra.mxu3 %v1015_v54  ;;  %v921_v33 = vadd.f32 %v851_v55, %v700_v57  ;;  %v922_v58 = vadd.f32 %v886_v56, %v702_v25 }
 0x1bd   : > { %v961_v61 = vadd.f32 %v1868_v51, %v921_v33  ;;  %v962_v31 = vadd.f32 %v1868_v51, %v922_v58 }
 0x1be   : > { %v1130_v59 = vpop.f32.mrf.mxu3 }
 0x1bf   : > { %1196 = vst [vmem:[%s2008_s8 + $0x80] sm:$0xff] %v1130_v59  ;;  %v997_v29 = vmax.f32 %v961_v61, 0.0  ;;  %v998_v41 = vmax.f32 %v962_v31, 0.0 }
 0x1c0   : > { %v1092_v60 = vpop.f32.mrf.mxu0 }
 0x1c1   : > { %1181 = vst [vmem:[%s2008_s8 + $0x8] sm:$0xff] %v1092_v60  ;;  %v1016_v63 = vpack.c.bf16 %v998_v41, %v997_v29 }
 0x1c6   : > { %v1132_v62 = vpop.f32.mrf.mxu3 }
 0x1c7   : > { %1197 = vst [vmem:[%s2008_s8 + $0x88] sm:$0xff] %v1132_v62 }
 0x1cb   : > { %1174 = vmatmul.bf16.gmra.mxu3 %v1016_v63 }
 0x1ce   : > { %v1135_v0 = vpop.f32.mrf.mxu3 }
 0x1cf   : > { %1198 = vst [vmem:[%s2008_s8 + $0x90] sm:$0xff] %v1135_v0 }
 0x1d6   : > { %v1137_v1 = vpop.f32.mrf.mxu3 }
 0x1d7   : > { %1199 = vst [vmem:[%s2008_s8 + $0x98] sm:$0xff] %v1137_v1 }
 0x1de   : > { %v1140_v2 = vpop.f32.mrf.mxu3 }
 0x1df   : > { %1200 = vst [vmem:[%s2008_s8 + $0xa0] sm:$0xff] %v1140_v2 }
 0x1e6   : > { %v1142_v51 = vpop.f32.mrf.mxu3 }
 0x1e7   : > { %1201 = vst [vmem:[%s2008_s8 + $0xa8] sm:$0xff] %v1142_v51 }
 0x1ee   : > { %v1145_v4 = vpop.f32.mrf.mxu3 }
 0x1ef   : > { %1202 = vst [vmem:[%s2008_s8 + $0xb0] sm:$0xff] %v1145_v4 }
 0x1f6   : > { %v1147_v5 = vpop.f32.mrf.mxu3 }
 0x1f7   : > { %1203 = vst [vmem:[%s2008_s8 + $0xb8] sm:$0xff] %v1147_v5 }
 0x1fe   : > { %v1150_v6 = vpop.f32.mrf.mxu3 }
 0x1ff   : > { %1204 = vst [vmem:[%s2008_s8 + $0xc0] sm:$0xff] %v1150_v6 }
 0x206   : > { %v1152_v7 = vpop.f32.mrf.mxu3 }
 0x207   : > { %1205 = vst [vmem:[%s2008_s8 + $0xc8] sm:$0xff] %v1152_v7 }
 0x20e   : > { %v1155_v8 = vpop.f32.mrf.mxu3 }
 0x20f   : > { %1206 = vst [vmem:[%s2008_s8 + $0xd0] sm:$0xff] %v1155_v8 }
 0x216   : > { %v1157_v9 = vpop.f32.mrf.mxu3 }
 0x217   : > { %1207 = vst [vmem:[%s2008_s8 + $0xd8] sm:$0xff] %v1157_v9 }
 0x21e   : > { %v1160_v10 = vpop.f32.mrf.mxu3 }
 0x21f   : > { %1208 = vst [vmem:[%s2008_s8 + $0xe0] sm:$0xff] %v1160_v10 }
 0x226   : > { %v1162_v11 = vpop.f32.mrf.mxu3 }
 0x227   : > { %1209 = vst [vmem:[%s2008_s8 + $0xe8] sm:$0xff] %v1162_v11 }
 0x22e   : > { %v1165_v12 = vpop.f32.mrf.mxu3 }
 0x22f   : > { %1210 = vst [vmem:[%s2008_s8 + $0xf0] sm:$0xff] %v1165_v12 }
 0x236   : > { %v1167_v13 = vpop.f32.mrf.mxu3 }
 0x237   : > { %1211 = vst [vmem:[%s2008_s8 + $0xf8] sm:$0xff] %v1167_v13 }
 0x23e   : > { %v1170_v14 = vpop.f32.mrf.mxu3 }
 0x23f   : > { %1212 = vst [vmem:[%s2008_s8 + $0x100] sm:$0xff] %v1170_v14 }
 0x246   : > { %v1172_v15 = vpop.f32.mrf.mxu3 }
 0x247   : > { %1213 = vst [vmem:[%s2008_s8 + $0x108] sm:$0xff] %v1172_v15 }
 0x24e   : > { %v1175_v16 = vpop.f32.mrf.mxu3 }
 0x24f   : > { %1214 = vst [vmem:[%s2008_s8 + $0x110] sm:$0xff] %v1175_v16 }
 0x256   : > { %v1177_v17 = vpop.f32.mrf.mxu3 }
 0x257   : > { %1215 = vst [vmem:[%s2008_s8 + $0x118] sm:$0xff] %v1177_v17 }
 0x258   : > { %1621 = shalt.err (!%p1618_p5)
}
 0x259   : > { %s1674_s29 = smov 128   ;;  %s1675_s7 = smov 8  }
 0x25a   : > { %1536 = dma.vmem_to_hbm [thread:$0]  (%p1741_p4), %s1232_s13, 4608, %s1234_s14, %s1217_s21, %s1674_s29, %s1674_s29, %s1675_s7  }
 0x25b PF: > { %p1542_p6 = scmp.ge.s32.totalorder %s1672_s20, 2  ;;  %s1248_s8 = sand.u32 1, %s1652_s15  }
 0x25c   : > { %s1249_s9 = scalar_lea.sflag [#allocation3], %s1248_s8 }
 0x25d   : > { %p1539_p7 = pnand %p1542_p6, %p1748_p8 }
 0x25f   : > { %p1540_p9 = pneg %p1539_p7 }
 0x261   : > { %1647 = dma.done.wait (%p1540_p9), %s1249_s9, 4608  }
 0x262   : > { %1649 = vsyncadd (%p1540_p9), %s1249_s9, 4294962688  ;;  %s17_s20 = sadd.s32 1, %s1672_s20   ;;  %s2170_s15 = smov %s1656_s16 }
 0x263   : > { %p14_p10 = scmp.ge.s32.totalorder %s17_s20, 4   ;;  %s2171_s16 = smov %s1660_s17 }
 0x264   : > { %s2172_s17 = smov %s1754_s28  ;;  %s2173_s18 = smov %s1668_s19 }
 0x265   : > { %s2174_s19 = smov %s2176_s23  ;;  %16 = sbr.rel (!%p14_p10) target bundleno = 4 (0x4), region = 73 }
 0x26a   :  { %1255 = vsyncpa [#allocation3], 1 }
 0x26b   :  { %1257 = vsyncpa [#allocation3 + $0x1], 1 }

</bundles_post_ra>
